<compile_context>
chip_gen: v7x
topology: tpu7x:2x2x1
jax: 0.10.0
libtpu: 0.0.40
codegen_flags: <defaults>
</compile_context>

<pallas_src>
import jax
import jax.numpy as jnp
from jax.experimental import pallas as pl
from jax.experimental.pallas import tpu as pltpu


# ----------------------------------------------------------------------------
# Kernels
# ----------------------------------------------------------------------------
def _norm_kernel(q_ref, out_ref):
    """Column-wise L2-normalize a (D, tK) tile; output in the same layout."""
    q = q_ref[...].astype(jnp.float32)                    # (D, tK)
    ssq = jnp.sum(q * q, axis=0, keepdims=True)           # (1, tK)  f32 accum
    # F.normalize(x, dim=0): x / max(||x||, 1e-12) == x * rsqrt(max(ssq, 1e-24))
    inv = jax.lax.rsqrt(jnp.maximum(ssq, 1e-24))          # EUP
    out_ref[...] = (q * inv).astype(out_ref.dtype)


def _norm_transpose_kernel(q_ref, out_ref):
    """Column-wise L2-normalize a (D, tK) tile and emit it transposed (tK, D).

    Fuses forward()'s .T into the kernel output layout; the transpose uses the
    otherwise-idle XLU and hides under the DMA.
    """
    q = q_ref[...].astype(jnp.float32)                    # (D, tK)
    ssq = jnp.sum(q * q, axis=0, keepdims=True)           # (1, tK)
    inv = jax.lax.rsqrt(jnp.maximum(ssq, 1e-24))
    out_ref[...] = jnp.transpose(q * inv).astype(out_ref.dtype)  # (tK, D)


# ----------------------------------------------------------------------------
# Tiling helpers
# ----------------------------------------------------------------------------
_TILE_CAP_BYTES = 4 << 20      # ~4 MiB/tile; double-buffered in+out ~= 16 MiB
_VMEM_LIMIT_BYTES = 32 << 20   # explicit scoped-VMEM limit (safe on v5e/v6e/v7x)


def _choose_block_k(D, K, itemsize):
    """Largest lane-dense K tile (multiple of 128) dividing K under the cap.

    K must already be a multiple of 128 (wrapper pads).  Prefers >= 2 grid
    steps so both v7x TensorCores get work on the 'parallel' axis.
    """
    max_tk = max(128, (_TILE_CAP_BYTES // (itemsize * D)) // 128 * 128)
    tk = min(K, max_tk)
    tk = max(128, (tk // 128) * 128)
    while tk > 128 and K % tk != 0:
        tk -= 128
    # Megacore: if the whole K fits in one tile, split into >= 2 steps.
    if tk == K and K >= 256:
        half = max(128, ((K // 2) // 128) * 128)
        while half > 128 and K % half != 0:
            half -= 128
        tk = half
    return tk


# ----------------------------------------------------------------------------
# Wrapper: one-shot normalization (the __init__-time work)
# ----------------------------------------------------------------------------
def normalize_queue(queue_raw, *, fuse_transpose, block_k=None):
    """L2-normalize (feature_dim, K) buffer along dim 0 with a Pallas kernel.

    Returns (K, D) when fuse_transpose=True (forward layout baked in),
    else (D, K).
    """
    D, K = queue_raw.shape
    itemsize = jnp.dtype(queue_raw.dtype).itemsize

    # Pad K up to a multiple of 128 (padded columns are harmless and sliced
    # off) instead of falling back to a single full-K block that could exceed
    # the scoped-VMEM limit (or v7x's 64 MiB physical VMEM).
    K_pad = pl.cdiv(K, 128) * 128
    padded = K_pad != K
    queue_in = jnp.pad(queue_raw, ((0, 0), (0, K_pad - K))) if padded else queue_raw

    if block_k is None:
        block_k = _choose_block_k(D, K_pad, itemsize)
    grid = (K_pad // block_k,)

    compiler_params = pltpu.CompilerParams(
        dimension_semantics=("parallel",),
        vmem_limit_bytes=_VMEM_LIMIT_BYTES,
    )

    if fuse_transpose:
        # Requires lane-dense D (multiple of 128) so output stores are unmasked.
        out = pl.pallas_call(
            _norm_transpose_kernel,
            out_shape=jax.ShapeDtypeStruct((K_pad, D), queue_raw.dtype),
            grid_spec=pltpu.PrefetchScalarGridSpec(
                num_scalar_prefetch=0,
                grid=grid,
                in_specs=[pl.BlockSpec((D, block_k), lambda i: (0, i))],
                out_specs=pl.BlockSpec((block_k, D), lambda i: (i, 0)),
            ),
            compiler_params=compiler_params,
        )(queue_in)
        return out[:K] if padded else out                  # (K, D)
    else:
        out = pl.pallas_call(
            _norm_kernel,
            out_shape=jax.ShapeDtypeStruct((D, K_pad), queue_raw.dtype),
            grid_spec=pltpu.PrefetchScalarGridSpec(
                num_scalar_prefetch=0,
                grid=grid,
                in_specs=[pl.BlockSpec((D, block_k), lambda i: (0, i))],
                out_specs=pl.BlockSpec((D, block_k), lambda i: (0, i)),
            ),
            compiler_params=compiler_params,
        )(queue_in)
        return out[:, :K] if padded else out               # (D, K)


# ----------------------------------------------------------------------------
# Module analogue: normalize ONCE at init; forward() is a cached layout view.
# ----------------------------------------------------------------------------
class QueueState:
    # TODO(synk): enqueue() (in-place ring-buffer rotation of the queue) is
    # buffer mutation outside forward(); not implemented here.

    def __init__(self, feature_dim, K, *, key, dtype=jnp.float32,
                 force_pallas=False):
        raw = jax.random.normal(key, (feature_dim, K), dtype=dtype)
        nbytes = raw.size * jnp.dtype(dtype).itemsize

        if nbytes < (256 << 10) and not force_pallas:
            # Tiny buffer: fixed pallas_call/DMA overhead dominates -> plain XLA.
            nrm = jnp.maximum(
                jnp.linalg.norm(raw.astype(jnp.float32), axis=0, keepdims=True),
                1e-12)
            qn = (raw.astype(jnp.float32) / nrm).astype(dtype)
            self._queue_t = qn.T
        elif feature_dim % 128 == 0:
            # Fused path: kernel emits the (K, D) forward layout directly.
            self._queue_t = normalize_queue(raw, fuse_transpose=True)
        else:
            # Non-lane-dense D: keep (D, K) kernel output; .T is layout-only.
            self._queue_t = normalize_queue(raw, fuse_transpose=False).T

    def forward(self):
        # forward() never re-normalizes; it returns the cached queue.T.
        return self._queue_t

    __call__ = forward


# ----------------------------------------------------------------------------
# Demo / correctness check
# ----------------------------------------------------------------------------
if __name__ == "__main__":
    key = jax.random.PRNGKey(0)
    k1, k2 = jax.random.split(key)

    def _ref(raw):
        nrm = jnp.maximum(jnp.linalg.norm(raw, axis=0, keepdims=True), 1e-12)
        return (raw / nrm).T

    # Case 1: feature_dim multiple of 128 -> fused normalize+transpose kernel.
    D1, K1 = 128, 256
    raw1 = jax.random.normal(k1, (D1, K1), dtype=jnp.float32)
    out1 = jax.block_until_ready(normalize_queue(raw1, fuse_transpose=True))
    assert out1.shape == (K1, D1)
    assert jnp.allclose(out1, _ref(raw1), atol=1e-5, rtol=1e-5)

    # Case 2: small feature_dim (not lane-dense) -> normalize kernel + wrapper .T.
    D2, K2 = 32, 256
    raw2 = jax.random.normal(k2, (D2, K2), dtype=jnp.float32)
    out2 = jax.block_until_ready(normalize_queue(raw2, fuse_transpose=False).T)
    assert out2.shape == (K2, D2)
    assert jnp.allclose(out2, _ref(raw2), atol=1e-5, rtol=1e-5)

    # End-to-end module semantics: normalize once at init, forward() = cached .T.
    q = QueueState(128, 256, key=jax.random.PRNGKey(0), force_pallas=True)
    out3 = jax.block_until_ready(q.forward())
    assert out3.shape == (256, 128)

    print("KERNEL_OK")
</pallas_src>

<mosaic_0001>
module attributes {stable_mosaic.version = 11 : i64} {
  func.func @_norm_transpose_kernel(%arg0: i32, %arg1: memref<128x128xf32, #tpu.memory_space<vmem>>, %arg2: memref<128x128xf32, #tpu.memory_space<vmem>>) attributes {dimension_semantics = [#tpu.dimension_semantics<parallel>], iteration_bounds = array<i64: 2>, scalar_prefetch = 0 : i64, scratch_operands = 0 : i64, tpu.core_type = #tpu.core_type<tc>, window_params = [{transform_indices = @transform_0, window_bounds = array<i64: 128, 128>}, {transform_indices = @transform_1, window_bounds = array<i64: 128, 128>}]} {
    %c0 = arith.constant 0 : index
    %c0_0 = arith.constant 0 : index
    %0 = vector.load %arg1[%c0, %c0_0] : memref<128x128xf32, #tpu.memory_space<vmem>>, vector<128x128xf32>
    %1 = arith.mulf %0, %0 : vector<128x128xf32>
    %cst = arith.constant dense<0.000000e+00> : vector<128xf32>
    %2 = vector.multi_reduction <add>, %1, %cst [0] : vector<128x128xf32> to vector<128xf32>
    %3 = vector.shape_cast %2 : vector<128xf32> to vector<1x128xf32>
    %cst_1 = arith.constant 1.000000e-24 : f32
    %4 = vector.broadcast %cst_1 : f32 to vector<1x128xf32>
    %5 = arith.maximumf %3, %4 : vector<1x128xf32>
    %6 = math.rsqrt %5 : vector<1x128xf32>
    %7 = vector.broadcast %6 : vector<1x128xf32> to vector<128x128xf32>
    %8 = arith.mulf %0, %7 : vector<128x128xf32>
    %9 = tpu.transpose %8, [1, 0] : vector<128x128xf32> -> vector<128x128xf32>
    %c0_2 = arith.constant 0 : index
    %c0_3 = arith.constant 0 : index
    %10 = vector.load %arg2[%c0_2, %c0_3] : memref<128x128xf32, #tpu.memory_space<vmem>>, vector<128x128xf32>
    tpu.vector_store %arg2[%c0_2, %c0_3], %9 {strides = array<i32>} : memref<128x128xf32, #tpu.memory_space<vmem>>, vector<128x128xf32>,
    return
  }
  func.func @transform_0(%arg0: i32) -> (i32, i32) {
    %c0_i32 = arith.constant 0 : i32
    %c0_i32_0 = arith.constant 0 : i32
    return %c0_i32, %arg0 : i32, i32
  }
  func.func @transform_1(%arg0: i32) -> (i32, i32) {
    %c0_i32 = arith.constant 0 : i32
    %c0_i32_0 = arith.constant 0 : i32
    return %arg0, %c0_i32 : i32, i32
  }
}

</mosaic_0001>

<bundles_post_ra>
// kernel: tpu_custom_call.1
= control target key start
LH: loop header
LB: loop body
LE: loop exit
PB: predicated region body
PF: predicated region fallthrough
CT: control target
= control target key end

     0   :  { %6 = vsyncpa [#allocation3], 0  ;;  %s728_s0 = inlined_call_operand.hbm [shape: f32[128,256], index: 0, kind: input, shape index: {}]   ;;  %s729_s1 = inlined_call_operand.hbm [shape: f32[256,128], index: 1, kind: output, shape index: {}]  }
   0x1   :  { %8 = vsyncpa [#allocation3 + $0x1], 0 }
   0x2   :  { %9 = vsyncpa [#allocation4], 0 }
   0x3   :  { %11 = vsyncpa [#allocation4 + $0x1], 0  ;;  %s523_s6 = smov 0   ;;  %s525_s7 = smov 0  }
   0x4   :  { %s527_s8 = smov 0   ;;  %s529_s9 = smov 0  }
   0x5 LB: > { %s544_s10 = sadd.s32 4294967295, %s504_s9   ;;  %s341_s11 = sadd.s32 4294967294, %s504_s9   ;;  %s504_s9 = sphi %s529_s9, %s743_s9   ;;  %s500_s8 = sphi %s527_s8, %s742_s8   ;;  %s496_s7 = sphi %s525_s7, %s741_s7   ;;  %s492_s6 = sphi %s523_s6, %s740_s6  }
   0x6   : > { %s548_s12 = sadd.s32 1, %s504_s9   ;;  %s24_s13 = sadd.s32 1, %s500_s8 }
   0x7   : > { %s21_s14 = ssub.s32 %s504_s9, %s548_s12  ;;  %p31_p0 = scmp.ne.s32.totalorder %s500_s8, %s496_s7 }
   0x8   : > { %p22_p1 = scmp.eq.s32.totalorder %s21_s14, 0  ;;  %p32_p2 = scmp.eq.s32.totalorder %s504_s9, 0 }
   0x9   : > { %p37_p3 = scmp.ne.s32.totalorder %s496_s7, %s492_s6  ;;  %p38_p4 = scmp.eq.s32.totalorder %s544_s10, 0 }
   0xa   : > { %s560_s15 = scalar_select %p22_p1, %s500_s8, %s24_s13  }
   0xb   : > { %p562_p5 = por %p32_p2, %p31_p0  ;;  %p566_p6 = por %p38_p4, %p37_p3 }
   0xc   : > { %p61_p7 = scmp.eq.s32.totalorder %s544_s10, 1  ;;  %p67_p8 = scmp.eq.s32.totalorder %s341_s11, 1 }
   0xd   : > { %p367_p10 = scmp.lt.s32.totalorder %s504_s9, 2  ;;  %s87_s20 = sand.u32 1, %s500_s8  }
   0xe   : > { %p573_p11 = por %p61_p7, %p31_p0  ;;  %p577_p12 = por %p67_p8, %p37_p3 }
   0xf   : > { %s345_s21 = sshll.u32 %s504_s9, 7  ;;  %s344_s22 = sshll.u32 %s87_s20, 7 }
  0x10   : > { %s733_s18 = scalar_select %p573_p11, 1, 0 }
  0x11   : > { %s734_s19 = scalar_select %p577_p12, 1, 0 }
  0x12   : > { %s586_s25 = scalar_lea.hbm %s728_s0, %s345_s21  ;;  %s91_s26 = scalar_lea.vmem [#allocation2], %s344_s22 }
  0x13   : > { %s97_s27 = sshll.u32 %s91_s26, 4  ;;  %p590_p13 = pnand %p367_p10, %p562_p5  ;;  %s594_s27 = int_to_ptr.vmem [resolvable:$true] %s97_s27 }
  0x14   : > { %s597_s29 = scalar_lea.sflag [#allocation3], %s87_s20  ;;  %s408_s30 = scalar_lea.hbm %s586_s25, 2048 }
  0x15   : > { %p409_p1 = scmp.ne.s32.totalorder %s586_s25, %s408_s30  ;;  %p410_p2 = pneg %p590_p13 }
  0x16   : > { %s413_s4 = scalar_lea.hbm %s728_s0, 4096  ;;  %p414_p5 = scmp.lt.u32.totalorder %s586_s25, %s728_s0 }
  0x17   : > { %p411_p3 = pnand %p410_p2, %p409_p1  ;;  %p415_p7 = scmp.lt.u32.totalorder %s413_s4, %s408_s30 }
  0x18   : > { %p417_p10 = scmp.lt.u32.totalorder %s408_s30, %s586_s25 }
  0x19   : > { %p412_p4 = pneg %p411_p3  ;;  %p416_p8 = por %p415_p7, %p414_p5 }
  0x1b   : > { %p418_p9 = por %p417_p10, %p416_p8 }
  0x1d   : > { %p419_p0 = pnand %p418_p9, %p412_p4 }
  0x1f   : > { %422 = shalt.err (!%p419_p0)
}
  0x20   : > { %s423_s13 = scalar_lea.vmem %s594_s27, 2048  ;;  %s506_s14 = smov [#allocation2]  }
  0x21   : > { %p424_p1 = scmp.ne.s32.totalorder %s594_s27, %s423_s13  ;;  %s428_s16 = sshll.u32 %s506_s14, 4  ;;  %s429_s16 = int_to_ptr.vmem [resolvable:$false] %s428_s16 }
  0x22   : > { %s430_s20 = scalar_lea.vmem %s429_s16, 4096  ;;  %p431_p11 = scmp.lt.s32.totalorder %s594_s27, %s429_s16 }
  0x23   : > { %p426_p3 = pnand %p424_p1, %p410_p2  ;;  %p432_p5 = scmp.lt.s32.totalorder %s430_s20, %s423_s13 }
  0x25   : > { %p427_p12 = pneg %p426_p3  ;;  %p433_p7 = por %p432_p5, %p431_p11 }
  0x27   : > { %p434_p8 = pnand %p433_p7, %p427_p12 }
  0x29   : > { %437 = shalt.err (!%p434_p8)
}
  0x2a   : > { %s507_s21 = smov 256   ;;  %s508_s22 = smov 128  }
  0x2b   : > { %s509_s23 = smov 8   ;;  %p105_p9 = scmp.lt.s32.totalorder %s504_s9, 3 }
  0x2c   : > { %362 = dma.hbm_to_vmem [thread:$0]  (!%p590_p13), %s586_s25, 2048, %s594_s27, %s597_s29, %s507_s21, %s508_s22, %s509_s23  }
  0x2d   : > { %p736_p0 = scmp.ge.s32.totalorder %s504_s9, 1 }
  0x2f   : > { %p106_p2 = pnand %p736_p0, %p105_p9 }
  0x30   : > { %s629_s24 = sand.u32 (!%p106_p2), 1, %s496_s7  }
  0x31   : > { %109 = sbr.rel (%p106_p2) target bundleno = 321 (0x141), region = 24  ;;  %s347_s26 = sshll.u32 (!%p106_p2), %s629_s24, 7 }
  0x32   : > { %s112_s30 = scalar_lea.sflag (!%p106_p2), [#allocation3], %s629_s24  ;;  %s635_s2 = scalar_lea.vmem (!%p106_p2), [#allocation2], %s347_s26 }
  0x38   : > { %483 = dma.done.wait (%p566_p6), %s112_s30, 2048  }
  0x39   : > { %485 = vsyncadd (%p566_p6), %s112_s30, 4294965248  ;;  %v135_v0 = vld [vmem:[%s635_s2] sm:$0xff]  ;;  %v136_v1 = vld [vmem:[%s635_s2 + $0x8] sm:$0xff]  ;;  %s659_s17 = scalar_lea.vmem [#allocation5], %s347_s26  ;;  %s354_s25 = sshll.u32 %s544_s10, 11 }
  0x3a   : > { %v137_v2 = vld [vmem:[%s635_s2 + $0x10] sm:$0xff]  ;;  %v138_v3 = vld [vmem:[%s635_s2 + $0x18] sm:$0xff]  ;;  %v151_v4 = vmul.f32 %v135_v0, %v135_v0  ;;  %v152_v5 = vmul.f32 %v136_v1, %v136_v1  ;;  %v139_v7 = vld [vmem:[%s635_s2 + $0x20] sm:$0xff]  ;;  %s268_s27 = sshll.u32 %s659_s17, 4  ;;  %s681_s3 = scalar_lea.hbm %s729_s1, %s354_s25  ;;  %s683_s27 = int_to_ptr.vmem [resolvable:$true] %s268_s27 }
  0x3b   : > { %v153_v6 = vmul.f32 %v137_v2, %v137_v2  ;;  %v154_v8 = vmul.f32 %v138_v3, %v138_v3  ;;  %v140_v10 = vld [vmem:[%s635_s2 + $0x28] sm:$0xff]  ;;  %v155_v11 = vmul.f32 %v139_v7, %v139_v7  ;;  %v141_v13 = vld [vmem:[%s635_s2 + $0x30] sm:$0xff]  ;;  %v142_v16 = vld [vmem:[%s635_s2 + $0x38] sm:$0xff]  ;;  %s255_s4 = scalar_lea.sflag [#allocation4], %s629_s24  ;;  %s438_s5 = scalar_lea.vmem %s683_s27, 2048 }
  0x3c   : > { %v167_v9 = vadd.f32 %v152_v5, %v151_v4  ;;  %v156_v14 = vmul.f32 %v140_v10, %v140_v10  ;;  %v157_v17 = vmul.f32 %v141_v13, %v141_v13  ;;  %v143_v19 = vld [vmem:[%s635_s2 + $0x40] sm:$0xff]  ;;  %v158_v20 = vmul.f32 %v142_v16, %v142_v16  ;;  %v144_v22 = vld [vmem:[%s635_s2 + $0x48] sm:$0xff]  ;;  %v145_v25 = vld [vmem:[%s635_s2 + $0x50] sm:$0xff]  ;;  %p439_p6 = scmp.ne.s32.totalorder %s683_s27, %s438_s5  ;;  %p737_p11 = scmp.ne.s32.totalorder %s733_s18, 0 }
  0x3d   : > { %v159_v23 = vmul.f32 %v143_v19, %v143_v19  ;;  %v160_v26 = vmul.f32 %v144_v22, %v144_v22  ;;  %v146_v28 = vld [vmem:[%s635_s2 + $0x58] sm:$0xff]  ;;  %v161_v29 = vmul.f32 %v145_v25, %v145_v25  ;;  %v147_v31 = vld [vmem:[%s635_s2 + $0x60] sm:$0xff]  ;;  %v148_v34 = vld [vmem:[%s635_s2 + $0x68] sm:$0xff]  ;;  %s510_s10 = smov [#allocation5]  }
  0x3e   : > { %v168_v12 = vadd.f32 %v167_v9, %v153_v6  ;;  %v162_v32 = vmul.f32 %v146_v28, %v146_v28  ;;  %v163_v35 = vmul.f32 %v147_v31, %v147_v31  ;;  %v149_v37 = vld [vmem:[%s635_s2 + $0x70] sm:$0xff]  ;;  %v164_v38 = vmul.f32 %v148_v34, %v148_v34  ;;  %v150_v40 = vld [vmem:[%s635_s2 + $0x78] sm:$0xff]  ;;  %p440_p12 = pnand %p439_p6, %p737_p11  ;;  %s442_s11 = sshll.u32 %s510_s10, 4  ;;  %s443_s11 = int_to_ptr.vmem [resolvable:$false] %s442_s11 }
  0x3f   : > { %v165_v41 = vmul.f32 %v149_v37, %v149_v37  ;;  %v166_v43 = vmul.f32 %v150_v40, %v150_v40  ;;  %s444_s13 = scalar_lea.vmem %s443_s11, 4096  ;;  %p445_p4 = scmp.lt.s32.totalorder %s683_s27, %s443_s11 }
  0x40   : > { %v169_v15 = vadd.f32 %v168_v12, %v154_v8  ;;  %p441_p13 = pneg %p440_p12  ;;  %p446_p10 = scmp.lt.s32.totalorder %s444_s13, %s438_s5 }
  0x42   : > { %v170_v18 = vadd.f32 %v169_v15, %v155_v11  ;;  %p447_p1 = por %p446_p10, %p445_p4 }
  0x44   : > { %v171_v21 = vadd.f32 %v170_v18, %v156_v14  ;;  %p448_p3 = pnand %p447_p1, %p441_p13 }
  0x46   : > { %v172_v24 = vadd.f32 %v171_v21, %v157_v17 }
  0x48   : > { %v173_v27 = vadd.f32 %v172_v24, %v158_v20 }
  0x4a   : > { %v174_v30 = vadd.f32 %v173_v27, %v159_v23 }
  0x4c   : > { %v175_v33 = vadd.f32 %v174_v30, %v160_v26 }
  0x4e   : > { %v176_v36 = vadd.f32 %v175_v33, %v161_v29 }
  0x50   : > { %v177_v39 = vadd.f32 %v176_v36, %v162_v32 }
  0x52   : > { %v178_v42 = vadd.f32 %v177_v39, %v163_v35 }
  0x54   : > { %v179_v44 = vadd.f32 %v178_v42, %v164_v38 }
  0x56   : > { %v180_v45 = vadd.f32 %v179_v44, %v165_v41 }
  0x58   : > { %v181_v46 = vadd.f32 %v180_v45, %v166_v43 }
  0x5a   : > { %v182_v47 = vrot.slane %v181_v46, 4 }
  0x5c   : > { %v183_v48 = vadd.f32 %v182_v47, %v181_v46 }
  0x5e   : > { %v184_v49 = vrot.slane %v183_v48, 2 }
  0x60   : > { %v185_v50 = vadd.f32 %v184_v49, %v183_v48 }
  0x62   : > { %v186_v51 = vrot.slane %v185_v50, 1 }
  0x64   : > { %v187_v52 = vadd.f32 %v186_v51, %v185_v50 }
  0x66   : > { %v188_v53 = vmax.f32 %v187_v52, 1e-24 }
  0x68   : > { %406 = vrsqrt.f32 %v188_v53 }
  0x72   : > { %v407_v54 = vpop.eup %406 }
  0x73   : > { %v190_v55 = vmul.f32 %v407_v54, %v135_v0  ;;  %v191_v56 = vmul.f32 %v407_v54, %v136_v1  ;;  %v204_v57 = vmul.f32 %v407_v54, %v149_v37  ;;  %v205_v58 = vmul.f32 %v407_v54, %v150_v40 }
  0x74   : > { %v192_v59 = vmul.f32 %v407_v54, %v137_v2  ;;  %v193_v60 = vmul.f32 %v407_v54, %v138_v3  ;;  %v194_v61 = vmul.f32 %v407_v54, %v139_v7  ;;  %v195_v62 = vmul.f32 %v407_v54, %v140_v10 }
  0x75   : > { %206 = vxpose.xlu0.b32.start [1/16] %v190_v55, 128  ;;  %v196_v63 = vmul.f32 %v407_v54, %v141_v13  ;;  %v197_v4 = vmul.f32 %v407_v54, %v142_v16  ;;  %v198_v5 = vmul.f32 %v407_v54, %v143_v19  ;;  %v199_v0 = vmul.f32 %v407_v54, %v144_v22 }
  0x76   : > { %v200_v1 = vmul.f32 %v407_v54, %v145_v25  ;;  %v201_v6 = vmul.f32 %v407_v54, %v146_v28  ;;  %v202_v2 = vmul.f32 %v407_v54, %v147_v31  ;;  %v203_v3 = vmul.f32 %v407_v54, %v148_v34 }
  0x79   : > { %207 = vxpose.xlu0.b32.cont [2/16] %v191_v56, 128 }
  0x7d   : > { %208 = vxpose.xlu0.b32.cont [3/16] %v192_v59, 128 }
  0x81   : > { %209 = vxpose.xlu0.b32.cont [4/16] %v193_v60, 128 }
  0x85   : > { %210 = vxpose.xlu0.b32.cont [5/16] %v194_v61, 128 }
  0x89   : > { %211 = vxpose.xlu0.b32.cont [6/16] %v195_v62, 128 }
  0x8d   : > { %212 = vxpose.xlu0.b32.cont [7/16] %v196_v63, 128 }
  0x91   : > { %213 = vxpose.xlu0.b32.cont [8/16] %v197_v4, 128 }
  0x95   : > { %214 = vxpose.xlu0.b32.cont [9/16] %v198_v5, 128 }
  0x99   : > { %215 = vxpose.xlu0.b32.cont [10/16] %v199_v0, 128 }
  0x9d   : > { %216 = vxpose.xlu0.b32.cont [11/16] %v200_v1, 128 }
  0xa1   : > { %217 = vxpose.xlu0.b32.cont [12/16] %v201_v6, 128 }
  0xa5   : > { %218 = vxpose.xlu0.b32.cont [13/16] %v202_v2, 128 }
  0xa9   : > { %219 = vxpose.xlu0.b32.cont [14/16] %v203_v3, 128 }
  0xad   : > { %220 = vxpose.xlu0.b32.cont [15/16] %v204_v57, 128 }
  0xb1   : > { %221 = vxpose.xlu0.b32.end [16/16] %v205_v58, 128 }
  0xf5   : > { %v222_v7 = vpop.trf.xlu0 }
  0xf6   : > { %238 = vst [vmem:[%s659_s17] sm:$0xff] %v222_v7 }
  0xf9   : > { %v223_v8 = vpop.trf.xlu0 }
  0xfa   : > { %239 = vst [vmem:[%s659_s17 + $0x8] sm:$0xff] %v223_v8 }
  0xfd   : > { %v224_v9 = vpop.trf.xlu0 }
  0xfe   : > { %240 = vst [vmem:[%s659_s17 + $0x10] sm:$0xff] %v224_v9 }
 0x101   : > { %v225_v10 = vpop.trf.xlu0 }
 0x102   : > { %241 = vst [vmem:[%s659_s17 + $0x18] sm:$0xff] %v225_v10 }
 0x105   : > { %v226_v11 = vpop.trf.xlu0 }
 0x106   : > { %242 = vst [vmem:[%s659_s17 + $0x20] sm:$0xff] %v226_v11 }
 0x109   : > { %v227_v12 = vpop.trf.xlu0 }
 0x10a   : > { %243 = vst [vmem:[%s659_s17 + $0x28] sm:$0xff] %v227_v12 }
 0x10d   : > { %v228_v13 = vpop.trf.xlu0 }
 0x10e   : > { %244 = vst [vmem:[%s659_s17 + $0x30] sm:$0xff] %v228_v13 }
 0x111   : > { %v229_v14 = vpop.trf.xlu0 }
 0x112   : > { %245 = vst [vmem:[%s659_s17 + $0x38] sm:$0xff] %v229_v14 }
 0x115   : > { %v230_v15 = vpop.trf.xlu0 }
 0x116   : > { %246 = vst [vmem:[%s659_s17 + $0x40] sm:$0xff] %v230_v15 }
 0x119   : > { %v231_v16 = vpop.trf.xlu0 }
 0x11a   : > { %247 = vst [vmem:[%s659_s17 + $0x48] sm:$0xff] %v231_v16 }
 0x11d   : > { %v232_v17 = vpop.trf.xlu0 }
 0x11e   : > { %248 = vst [vmem:[%s659_s17 + $0x50] sm:$0xff] %v232_v17 }
 0x121   : > { %v233_v18 = vpop.trf.xlu0 }
 0x122   : > { %249 = vst [vmem:[%s659_s17 + $0x58] sm:$0xff] %v233_v18 }
 0x125   : > { %v234_v19 = vpop.trf.xlu0 }
 0x126   : > { %250 = vst [vmem:[%s659_s17 + $0x60] sm:$0xff] %v234_v19 }
 0x129   : > { %v235_v20 = vpop.trf.xlu0 }
 0x12a   : > { %251 = vst [vmem:[%s659_s17 + $0x68] sm:$0xff] %v235_v20 }
 0x12d   : > { %v236_v21 = vpop.trf.xlu0 }
 0x12e   : > { %252 = vst [vmem:[%s659_s17 + $0x70] sm:$0xff] %v236_v21 }
 0x131   : > { %v237_v22 = vpop.trf.xlu0 }
 0x132   : > { %253 = vst [vmem:[%s659_s17 + $0x78] sm:$0xff] %v237_v22 }
 0x133   : > { %451 = shalt.err (!%p448_p3)
}
 0x134   : > { %s452_s14 = scalar_lea.hbm %s681_s3, 2048  ;;  %s456_s21 = scalar_lea.hbm %s729_s1, 4096 }
 0x135   : > { %p453_p5 = scmp.ne.s32.totalorder %s681_s3, %s452_s14  ;;  %p457_p9 = scmp.lt.u32.totalorder %s681_s3, %s729_s1 }
 0x136   : > { %p458_p0 = scmp.lt.u32.totalorder %s456_s21, %s452_s14  ;;  %p460_p6 = scmp.lt.u32.totalorder %s452_s14, %s681_s3 }
 0x137   : > { %p454_p7 = pnand %p453_p5, %p737_p11 }
 0x138   : > { %p459_p2 = por %p458_p0, %p457_p9 }
 0x139   : > { %p455_p8 = pneg %p454_p7 }
 0x13a   : > { %p461_p12 = por %p460_p6, %p459_p2 }
 0x13c   : > { %p462_p13 = pnand %p461_p12, %p455_p8 }
 0x13e   : > { %465 = shalt.err (!%p462_p13)
}
 0x13f   : > { %s511_s26 = smov 128   ;;  %s512_s30 = smov 8  }
 0x140   : > { %357 = dma.vmem_to_hbm [thread:$0]  (%p737_p11), %s683_s27, 2048, %s681_s3, %s255_s4, %s511_s26, %s511_s26, %s512_s30  }
 0x141 PF: > { %s283_s2 = sand.u32 1, %s492_s6   ;;  %p738_p4 = scmp.ne.s32.totalorder %s734_s19, 0 }
 0x142   : > { %p739_p10 = scmp.ge.s32.totalorder %s504_s9, 2  ;;  %s284_s17 = scalar_lea.sflag [#allocation4], %s283_s2 }
 0x144   : > { %p364_p1 = pnand %p739_p10, %p738_p4 }
 0x146   : > { %487 = dma.done.wait (!%p364_p1), %s284_s17, 2048  }
 0x147   : > { %489 = vsyncadd (!%p364_p1), %s284_s17, 4294965248  ;;  %p14_p3 = scmp.ge.s32.totalorder %s548_s12, 4   ;;  %s740_s6 = smov %s496_s7 }
 0x148   : > { %s741_s7 = smov %s500_s8  ;;  %s742_s8 = smov %s560_s15 }
 0x149   : > { %s743_s9 = smov %s548_s12  ;;  %16 = sbr.rel (!%p14_p3) target bundleno = 5 (0x5), region = 69 }
 0x150   :  { %289 = vsyncpa [#allocation3], 1 }
 0x151   :  { %291 = vsyncpa [#allocation3 + $0x1], 1 }
 0x152   :  { %292 = vsyncpa [#allocation4], 1 }
 0x153   :  { %294 = vsyncpa [#allocation4 + $0x1], 1 }

</bundles_post_ra>
